<compile_context>
chip_gen: v7x
topology: tpu7x:2x2x1
jax: 0.10.0
libtpu: 0.0.40
codegen_flags: <defaults>
</compile_context>

<pallas_src>
import functools

import numpy as np
import jax
import jax.numpy as jnp
from jax.experimental import pallas as pl
from jax.experimental.pallas import tpu as pltpu


def _round_up(x, m):
    return (x + m - 1) // m * m


def _pad_to(arr, shape):
    pads = [(0, s - d) for s, d in zip(shape, arr.shape)]
    return jnp.pad(arr, pads)


# -----------------------------------------------------------------------------
# Kernel 1: fused node projections.
#   Wh  = leakyrelu(X @ W + bW)   -> bf16 (feeds later MXU matmuls)
#   res = X @ r + br              -> bf16
#   f12 = Wh @ [a1 | a2]          -> f32 per-node attention scores (bias added later)
# -----------------------------------------------------------------------------
def _proj_kernel(x_ref, w_ref, b_ref, a_ref, wh_ref, res_ref, f12_ref, *, alpha, d_pad):
    xw = jnp.dot(x_ref[...], w_ref[...],
                 preferred_element_type=jnp.float32) + b_ref[...]     # (tq, 2*Dp) f32
    pre = xw[:, :d_pad]
    wh = jnp.maximum(pre, alpha * pre)        # leakyrelu via max (cheaper than cmp+select)
    whb = wh.astype(jnp.bfloat16)
    wh_ref[...] = whb
    res_ref[...] = xw[:, d_pad:].astype(jnp.bfloat16)
    # fused [a1 | a2] matmul (one 2-wide output instead of two 1-wide matmuls)
    f12_ref[...] = jnp.dot(whb, a_ref[...], preferred_element_type=jnp.float32)


# -----------------------------------------------------------------------------
# Kernel 2: flash-style masked attention aggregation with sparse block skipping.
#   grid = (B, nq, kv); kv axis last ("arbitrary"); l / acc accumulators in VMEM.
#   Scalar-prefetched kjmap (flattened (nq*max_nk,)) and kcount ((nq,)) pick only
#   the non-empty key blocks for each query tile.
# -----------------------------------------------------------------------------
def _attn_kernel(kjmap_ref, kcnt_ref,
                 qa_ref, qb_ref, eps_ref, ka_ref, kb_ref, whk_ref, res_ref, adj_ref,
                 out_ref, l_sc, acc_sc, *, alpha):
    del kjmap_ref  # only used by the index_maps
    qi = pl.program_id(1)
    kj = pl.program_id(2)
    count = kcnt_ref[qi]

    @pl.when(kj == 0)
    def _init():
        l_sc[...] = jnp.zeros_like(l_sc)
        acc_sc[...] = jnp.zeros_like(acc_sc)

    @pl.when(kj < count)                       # padded tail steps: no compute at all
    def _compute():
        # s_ij - m_i = min(qa_i + ka_j, qb_i + kb_j)   (ba, alpha and -m_i pre-folded)
        expo = jnp.minimum(qa_ref[...] + ka_ref[...], qb_ref[...] + kb_ref[...])
        p = jnp.where(adj_ref[...] != 0, jnp.exp(expo), 0.0)          # (tq, tk) f32
        l_sc[...] += jnp.sum(p, axis=-1, keepdims=True)
        acc_sc[...] += jnp.dot(p.astype(jnp.bfloat16), whk_ref[...],
                               preferred_element_type=jnp.float32)

    @pl.when(kj == count - 1)
    def _finalize():
        l = l_sc[...]
        # Reference: h = (Σ_j e_ij Wh_j) / (Σ_j e_ij + 9e-15).  The accumulators carry
        # a factor exp(-m_i); eps_ref = 9e-15 * exp(-m_i) keeps the math identical.
        h = acc_sc[...] * pl.reciprocal(l + eps_ref[...], approx=True)   # EUP, not VALU
        h = jnp.where(l > 0, h, 0.0)           # rows with no neighbours -> 0
        hr = h + res_ref[...].astype(jnp.float32)
        out_ref[...] = jnp.maximum(hr, alpha * hr).astype(out_ref.dtype)


# -----------------------------------------------------------------------------
# Wrapper
# -----------------------------------------------------------------------------
def attn_forward(x, params, adj, *, alpha=0.2, tile_q=None, tile_k=None):
    """x: (B, N, in_dim) f32; adj: (N, N) CONCRETE adjacency (static graph, like
    `self.A` in the module); params = (ww, bw, wr, br, a1, a2, ba) with Linear weights
    stored pre-transposed as (in, out).  Returns (B, N, out_dim) f32."""
    assert 0.0 < alpha <= 1.0
    ww, bw, wr, br, a1, a2, ba = params
    B, N, in_dim = x.shape
    D = ww.shape[1]

    # ---- tile / padding choices (lane-dense, VMEM-budgeted) ----------------------
    d_pad = _round_up(D, 128)                   # lane-dense Wh / res / output
    if tile_q is None or tile_k is None:
        if N <= 512:
            tile_q = tile_k = _round_up(N, 128)  # single, fully lane-dense tile
        else:
            # ~4 MiB live VMEM per step: fits the 32 MiB scoped limit on every
            # generation including v7x (64 MiB physical).
            tile_q, tile_k = 512, 512
            # TODO(synk): on v5e/v6e (128 MiB VMEM) sweep tile_q/tile_k up to 1024 with
            # vmem_limit_bytes ~64 MiB if profiling shows DMA / step-overhead exposure.
    n_pad = _round_up(N, max(tile_q, tile_k))
    assert n_pad % tile_q == 0 and n_pad % tile_k == 0
    nq, nk = n_pad // tile_q, n_pad // tile_k

    # ---- static sparse-block schedule (graph structure is fixed -> host numpy) ----
    adj_np = np.asarray(jax.device_get(adj)) != 0
    adj_pad = np.zeros((n_pad, n_pad), dtype=np.int8)
    adj_pad[:N, :N] = adj_np
    occ = adj_pad.reshape(nq, tile_q, nk, tile_k).any(axis=(1, 3))     # (nq, nk)
    counts = occ.sum(axis=1).astype(np.int32)
    max_nk = max(int(counts.max()), 1)
    kjmap = np.zeros((nq, max_nk), dtype=np.int32)
    for qi in range(nq):
        nz = np.nonzero(occ[qi])[0]
        if nz.size:
            kjmap[qi, :nz.size] = nz
            kjmap[qi, nz.size:] = nz[-1]        # repeat last block: pipeline skips refetch
    counts = np.maximum(counts, 1)              # empty q-tiles still run one (zero) block
    kjmap_flat = jnp.asarray(kjmap.reshape(-1))             # 1-D SMEM (no 2-D padding)
    counts_j = jnp.asarray(counts)

    # ---- wrapper-side layout plumbing (padding + dtype casts) ----------------------
    xp = _pad_to(x, (B, n_pad, in_dim)).astype(jnp.bfloat16)
    w2 = jnp.concatenate([_pad_to(ww, (in_dim, d_pad)),
                          _pad_to(wr, (in_dim, d_pad))], axis=1).astype(jnp.bfloat16)
    b2 = jnp.concatenate([_pad_to(bw, (1, d_pad)),
                          _pad_to(br, (1, d_pad))], axis=1).astype(jnp.float32)
    a12 = jnp.concatenate([_pad_to(a1, (d_pad, 1)),
                           _pad_to(a2, (d_pad, 1))], axis=1).astype(jnp.bfloat16)

    # ---- kernel 1: projections ------------------------------------------------------
    wh, res, f12 = pl.pallas_call(
        functools.partial(_proj_kernel, alpha=alpha, d_pad=d_pad),
        out_shape=(jax.ShapeDtypeStruct((B, n_pad, d_pad), jnp.bfloat16),
                   jax.ShapeDtypeStruct((B, n_pad, d_pad), jnp.bfloat16),
                   jax.ShapeDtypeStruct((B, n_pad, 2), jnp.float32)),
        grid_spec=pltpu.PrefetchScalarGridSpec(
            num_scalar_prefetch=0,
            grid=(B, nq),
            in_specs=[
                pl.BlockSpec((None, tile_q, in_dim), lambda b, i: (b, i, 0)),
                pl.BlockSpec((in_dim, 2 * d_pad), lambda b, i: (0, 0)),
                pl.BlockSpec((1, 2 * d_pad), lambda b, i: (0, 0)),
                pl.BlockSpec((d_pad, 2), lambda b, i: (0, 0)),
            ],
            out_specs=[
                pl.BlockSpec((None, tile_q, d_pad), lambda b, i: (b, i, 0)),
                pl.BlockSpec((None, tile_q, d_pad), lambda b, i: (b, i, 0)),
                pl.BlockSpec((None, tile_q, 2), lambda b, i: (b, i, 0)),
            ],
        ),
        compiler_params=pltpu.CompilerParams(
            dimension_semantics=("parallel", "parallel"),
            vmem_limit_bytes=32 * 1024 * 1024,
        ),
    )(xp, w2, b2, a12)

    # ---- tiny per-node score math (few-KiB arrays; fused into small XLA ops) --------
    # Exact per-row stabilizer: leakyrelu is monotone, so
    #   m_i = max_j s_ij = -leaky(f1_i + min_j f2_j + ba).
    # Pre-fold ba, alpha and -m into qa/qb (query) and ka/kb (key) so the hot kernel-2
    # tile needs only 2 adds + 1 min before the exp.
    f1 = f12[..., 0] + ba.reshape(())                 # includes the `a` bias
    f2 = f12[..., 1]
    minf2 = jnp.min(f2[:, :N], axis=-1, keepdims=True)
    zmin = f1 + minf2
    m = -jnp.maximum(zmin, alpha * zmin)              # (B, n_pad)
    qa = (-f1 - m)[..., None]                         # (B, n_pad, 1)
    qb = (-alpha * f1 - m)[..., None]
    eps = (jnp.float32(9e-15) * jnp.exp(-m))[..., None]
    ka = (-f2)[:, None, :]                            # (B, 1, n_pad), lane-dense
    kb = (-alpha * f2)[:, None, :]

    # ---- kernel 2: tiled masked attention with sparse block skipping ----------------
    def q_idx(b, qi, kj, kjmap_r, kcnt_r):
        return (b, qi, 0)

    def k_vec_idx(b, qi, kj, kjmap_r, kcnt_r):
        return (b, 0, kjmap_r[qi * max_nk + kj])

    def k_wh_idx(b, qi, kj, kjmap_r, kcnt_r):
        return (b, kjmap_r[qi * max_nk + kj], 0)

    def adj_idx(b, qi, kj, kjmap_r, kcnt_r):
        return (qi, kjmap_r[qi * max_nk + kj])

    # TODO(synk): for large B, reuse adjacency tiles across the batch (inner batch loop
    # or a small batch extent on the q/k blocks) to cut the B*N^2 adjacency stream.
    out_padded = pl.pallas_call(
        functools.partial(_attn_kernel, alpha=alpha),
        out_shape=jax.ShapeDtypeStruct((B, n_pad, d_pad), jnp.float32),
        grid_spec=pltpu.PrefetchScalarGridSpec(
            num_scalar_prefetch=2,                    # kjmap_flat, counts -> SMEM
            grid=(B, nq, max_nk),                     # kv (reduction) axis last
            in_specs=[
                pl.BlockSpec((None, tile_q, 1), q_idx),         # qa (resident over kj)
                pl.BlockSpec((None, tile_q, 1), q_idx),         # qb
                pl.BlockSpec((None, tile_q, 1), q_idx),         # eps = 9e-15*exp(-m)
                pl.BlockSpec((None, 1, tile_k), k_vec_idx),     # ka (lane-dense)
                pl.BlockSpec((None, 1, tile_k), k_vec_idx),     # kb
                pl.BlockSpec((None, tile_k, d_pad), k_wh_idx),  # Wh (keys), bf16
                pl.BlockSpec((None, tile_q, d_pad), q_idx),     # res, bf16 (resident)
                pl.BlockSpec((tile_q, tile_k), adj_idx),        # int8 adjacency mask
            ],
            out_specs=pl.BlockSpec((None, tile_q, d_pad), q_idx),
            scratch_shapes=[
                pltpu.VMEM((tile_q, 1), jnp.float32),           # running rowsum l
                pltpu.VMEM((tile_q, d_pad), jnp.float32),       # running Σ e_ij Wh_j
            ],
        ),
        compiler_params=pltpu.CompilerParams(
            dimension_semantics=("parallel", "parallel", "arbitrary"),
            vmem_limit_bytes=32 * 1024 * 1024,
        ),
    )(kjmap_flat, counts_j, qa, qb, eps, ka, kb, wh, res, jnp.asarray(adj_pad))

    return out_padded[:, :N, :D]


def attn_reference(x, params, adj, *, alpha=0.2):
    """Pure-JAX dense equivalent of the PyTorch sparse forward (for checking)."""
    ww, bw, wr, br, a1, a2, ba = params
    leaky = lambda v: jnp.where(v > 0, v, alpha * v)
    wh = leaky(x @ ww + bw)
    res = x @ wr + br
    f1 = wh @ a1
    f2 = wh @ a2
    logits = f1 + jnp.swapaxes(f2, -1, -2) + ba[0, 0]
    e = jnp.exp(-leaky(logits))
    E = jnp.where(adj[None] != 0, e, 0.0)
    rowsum = E.sum(-1, keepdims=True)
    h = (E @ wh) / (rowsum + 9e-15)
    return leaky(h + res)


if __name__ == "__main__":
    alpha = 0.2
    key = jax.random.PRNGKey(0)

    def make_case(k, B, N, in_dim, out_dim, density=0.4):
        k_x, k_ww, k_bw, k_wr, k_br, k_a, k_ba, k_adj = jax.random.split(k, 8)
        x = jax.random.normal(k_x, (B, N, in_dim), dtype=jnp.float32)
        ww = jax.random.normal(k_ww, (in_dim, out_dim), dtype=jnp.float32) * 0.1
        bw = jax.random.normal(k_bw, (1, out_dim), dtype=jnp.float32) * 0.1
        wr = jax.random.normal(k_wr, (in_dim, out_dim), dtype=jnp.float32) * 0.1
        br = jax.random.normal(k_br, (1, out_dim), dtype=jnp.float32) * 0.1
        a_w = jax.random.normal(k_a, (2 * out_dim, 1), dtype=jnp.float32) * 0.1
        a1, a2 = a_w[:out_dim, :], a_w[out_dim:, :]
        ba = jax.random.normal(k_ba, (1, 1), dtype=jnp.float32) * 0.1
        adj = (jax.random.uniform(k_adj, (N, N)) < density).astype(jnp.float32)
        adj = jnp.maximum(adj, jnp.eye(N, dtype=jnp.float32))
        return x, (ww, bw, wr, br, a1, a2, ba), adj

    k1, k2, k3 = jax.random.split(key, 3)

    # Case 1: module-sized small shapes (single 128x128 tile path).
    x, params, adj = make_case(k1, B=2, N=8, in_dim=16, out_dim=32)
    out = jax.block_until_ready(attn_forward(x, params, adj, alpha=alpha))
    ref = attn_reference(x, params, adj, alpha=alpha)
    assert out.shape == ref.shape == (2, 8, 32)
    assert jnp.allclose(out, ref, rtol=2e-2, atol=2e-2), "case1 mismatch vs reference"

    # Case 2: multi-tile path (nq=4, nk=2 over padded N) with a sparse random graph.
    x2, params2, adj2 = make_case(k2, B=2, N=200, in_dim=16, out_dim=32, density=0.05)
    out2 = jax.block_until_ready(
        attn_forward(x2, params2, adj2, alpha=alpha, tile_q=64, tile_k=128))
    ref2 = attn_reference(x2, params2, adj2, alpha=alpha)
    assert out2.shape == ref2.shape == (2, 200, 32)
    assert jnp.allclose(out2, ref2, rtol=2e-2, atol=2e-2), "case2 mismatch vs reference"

    # Case 3: block-structured sparse adjacency exercising the data-dependent block
    # schedule (kjmap/counts), the pl.when tail, the count==0 fallback and the
    # rows-with-no-neighbours path.
    N3 = 384
    x3, params3, _ = make_case(k3, B=2, N=N3, in_dim=16, out_dim=32, density=0.0)
    rng = np.random.default_rng(0)
    adj3_np = np.zeros((N3, N3), dtype=np.float32)
    adj3_np[0:128, 128:256] = (rng.random((128, 128)) < 0.3)
    adj3_np[0:128, 256:384] = (rng.random((128, 128)) < 0.1)
    adj3_np[256:384, 0:128] = (rng.random((128, 128)) < 0.2)
    # rows 128..255 have NO edges at all (empty q-block).
    adj3 = jnp.asarray(adj3_np)
    out3 = jax.block_until_ready(
        attn_forward(x3, params3, adj3, alpha=alpha, tile_q=128, tile_k=128))
    ref3 = attn_reference(x3, params3, adj3, alpha=alpha)
    assert out3.shape == ref3.shape == (2, N3, 32)
    assert jnp.allclose(out3, ref3, rtol=2e-2, atol=2e-2), "case3 mismatch vs reference"

    print("KERNEL_OK")
</pallas_src>

<mosaic_0001>
module attributes {stable_mosaic.version = 11 : i64} {
  func.func @_proj_kernel(%arg0: i32, %arg1: i32, %arg2: memref<1x128x16xbf16, #tpu.memory_space<vmem>>, %arg3: memref<16x256xbf16, #tpu.memory_space<vmem>>, %arg4: memref<1x256xf32, #tpu.memory_space<vmem>>, %arg5: memref<128x2xbf16, #tpu.memory_space<vmem>>, %arg6: memref<1x128x128xbf16, #tpu.memory_space<vmem>>, %arg7: memref<1x128x128xbf16, #tpu.memory_space<vmem>>, %arg8: memref<1x128x2xf32, #tpu.memory_space<vmem>>) attributes {dimension_semantics = [#tpu.dimension_semantics<parallel>, #tpu.dimension_semantics<parallel>], iteration_bounds = array<i64: 2, 1>, scalar_prefetch = 0 : i64, scratch_operands = 0 : i64, tpu.core_type = #tpu.core_type<tc>, window_params = [{transform_indices = @transform_0, window_bounds = array<i64: 1, 128, 16>}, {pipeline_mode = #tpu.pipeline_mode<synchronous>, transform_indices = @transform_1, window_bounds = array<i64: 16, 256>}, {pipeline_mode = #tpu.pipeline_mode<synchronous>, transform_indices = @transform_2, window_bounds = array<i64: 1, 256>}, {pipeline_mode = #tpu.pipeline_mode<synchronous>, transform_indices = @transform_3, window_bounds = array<i64: 128, 2>}, {transform_indices = @transform_4, window_bounds = array<i64: 1, 128, 128>}, {transform_indices = @transform_5, window_bounds = array<i64: 1, 128, 128>}, {transform_indices = @transform_6, window_bounds = array<i64: 1, 128, 2>}]} {
    %c0 = arith.constant 0 : index
    %c0_0 = arith.constant 0 : index
    %c0_1 = arith.constant 0 : index
    %0 = vector.load %arg2[%c0, %c0_0, %c0_1] : memref<1x128x16xbf16, #tpu.memory_space<vmem>>, vector<1x128x16xbf16>
    %1 = vector.shape_cast %0 : vector<1x128x16xbf16> to vector<128x16xbf16>
    %c0_2 = arith.constant 0 : index
    %c0_3 = arith.constant 0 : index
    %2 = vector.load %arg3[%c0_2, %c0_3] : memref<16x256xbf16, #tpu.memory_space<vmem>>, vector<16x256xbf16>
    %cst = arith.constant dense<0.000000e+00> : vector<128x256xf32>
    %3 = tpu.matmul %1, %2, %cst {dimension_numbers = #tpu.dot_dimension_numbers<[1], [0], [0], [1], [0, 0, 1, 1], [], []>} : vector<128x16xbf16>, vector<16x256xbf16>, vector<128x256xf32> -> vector<128x256xf32>
    %c0_4 = arith.constant 0 : index
    %c0_5 = arith.constant 0 : index
    %4 = vector.load %arg4[%c0_4, %c0_5] : memref<1x256xf32, #tpu.memory_space<vmem>>, vector<1x256xf32>
    %5 = vector.broadcast %4 : vector<1x256xf32> to vector<128x256xf32>
    %6 = arith.addf %3, %5 : vector<128x256xf32>
    %7 = vector.extract_strided_slice %6 {offsets = [0, 0], sizes = [128, 128], strides = [1, 1]} : vector<128x256xf32> to vector<128x128xf32>
    %cst_6 = arith.constant 2.000000e-01 : f32
    %8 = vector.broadcast %cst_6 : f32 to vector<128x128xf32>
    %9 = arith.mulf %8, %7 : vector<128x128xf32>
    %10 = arith.maximumf %7, %9 : vector<128x128xf32>
    %11 = arith.truncf %10 : vector<128x128xf32> to vector<128x128xbf16>
    %c0_7 = arith.constant 0 : index
    %c0_8 = arith.constant 0 : index
    %c0_9 = arith.constant 0 : index
    %12 = vector.load %arg6[%c0_7, %c0_8, %c0_9] : memref<1x128x128xbf16, #tpu.memory_space<vmem>>, vector<1x128x128xbf16>
    %13 = vector.shape_cast %12 : vector<1x128x128xbf16> to vector<128x128xbf16>
    %14 = vector.shape_cast %11 : vector<128x128xbf16> to vector<1x128x128xbf16>
    tpu.vector_store %arg6[%c0_7, %c0_8, %c0_9], %14 {strides = array<i32>} : memref<1x128x128xbf16, #tpu.memory_space<vmem>>, vector<1x128x128xbf16>,
    %15 = vector.extract_strided_slice %6 {offsets = [0, 128], sizes = [128, 128], strides = [1, 1]} : vector<128x256xf32> to vector<128x128xf32>
    %16 = arith.truncf %15 : vector<128x128xf32> to vector<128x128xbf16>
    %c0_10 = arith.constant 0 : index
    %c0_11 = arith.constant 0 : index
    %c0_12 = arith.constant 0 : index
    %17 = vector.load %arg7[%c0_10, %c0_11, %c0_12] : memref<1x128x128xbf16, #tpu.memory_space<vmem>>, vector<1x128x128xbf16>
    %18 = vector.shape_cast %17 : vector<1x128x128xbf16> to vector<128x128xbf16>
    %19 = vector.shape_cast %16 : vector<128x128xbf16> to vector<1x128x128xbf16>
    tpu.vector_store %arg7[%c0_10, %c0_11, %c0_12], %19 {strides = array<i32>} : memref<1x128x128xbf16, #tpu.memory_space<vmem>>, vector<1x128x128xbf16>,
    %c0_13 = arith.constant 0 : index
    %c0_14 = arith.constant 0 : index
    %20 = vector.load %arg5[%c0_13, %c0_14] : memref<128x2xbf16, #tpu.memory_space<vmem>>, vector<128x2xbf16>
    %cst_15 = arith.constant dense<0.000000e+00> : vector<128x2xf32>
    %21 = tpu.matmul %11, %20, %cst_15 {dimension_numbers = #tpu.dot_dimension_numbers<[1], [0], [0], [1], [0, 0, 1, 1], [], []>} : vector<128x128xbf16>, vector<128x2xbf16>, vector<128x2xf32> -> vector<128x2xf32>
    %c0_16 = arith.constant 0 : index
    %c0_17 = arith.constant 0 : index
    %c0_18 = arith.constant 0 : index
    %22 = vector.load %arg8[%c0_16, %c0_17, %c0_18] : memref<1x128x2xf32, #tpu.memory_space<vmem>>, vector<1x128x2xf32>
    %23 = vector.shape_cast %22 : vector<1x128x2xf32> to vector<128x2xf32>
    %24 = vector.shape_cast %21 : vector<128x2xf32> to vector<1x128x2xf32>
    tpu.vector_store %arg8[%c0_16, %c0_17, %c0_18], %24 {strides = array<i32>} : memref<1x128x2xf32, #tpu.memory_space<vmem>>, vector<1x128x2xf32>,
    return
  }
  func.func @transform_0(%arg0: i32, %arg1: i32) -> (i32, i32, i32) {
    %c0_i32 = arith.constant 0 : i32
    %c0_i32_0 = arith.constant 0 : i32
    return %arg0, %arg1, %c0_i32 : i32, i32, i32
  }
  func.func @transform_1(%arg0: i32, %arg1: i32) -> (i32, i32) {
    %c0_i32 = arith.constant 0 : i32
    %c0_i32_0 = arith.constant 0 : i32
    %c0_i32_1 = arith.constant 0 : i32
    return %c0_i32, %c0_i32_0 : i32, i32
  }
  func.func @transform_2(%arg0: i32, %arg1: i32) -> (i32, i32) {
    %c0_i32 = arith.constant 0 : i32
    %c0_i32_0 = arith.constant 0 : i32
    %c0_i32_1 = arith.constant 0 : i32
    return %c0_i32, %c0_i32_0 : i32, i32
  }
  func.func @transform_3(%arg0: i32, %arg1: i32) -> (i32, i32) {
    %c0_i32 = arith.constant 0 : i32
    %c0_i32_0 = arith.constant 0 : i32
    %c0_i32_1 = arith.constant 0 : i32
    return %c0_i32, %c0_i32_0 : i32, i32
  }
  func.func @transform_4(%arg0: i32, %arg1: i32) -> (i32, i32, i32) {
    %c0_i32 = arith.constant 0 : i32
    %c0_i32_0 = arith.constant 0 : i32
    return %arg0, %arg1, %c0_i32 : i32, i32, i32
  }
  func.func @transform_5(%arg0: i32, %arg1: i32) -> (i32, i32, i32) {
    %c0_i32 = arith.constant 0 : i32
    %c0_i32_0 = arith.constant 0 : i32
    return %arg0, %arg1, %c0_i32 : i32, i32, i32
  }
  func.func @transform_6(%arg0: i32, %arg1: i32) -> (i32, i32, i32) {
    %c0_i32 = arith.constant 0 : i32
    %c0_i32_0 = arith.constant 0 : i32
    return %arg0, %arg1, %c0_i32 : i32, i32, i32
  }
}

</mosaic_0001>

<bundles_post_ra>
// kernel: tpu_custom_call.1
= control target key start
LH: loop header
LB: loop body
LE: loop exit
PB: predicated region body
PF: predicated region fallthrough
CT: control target
= control target key end

     0   :  { %s1908_s0 = inlined_call_operand.vmem [shape: bf16[2,128,16], index: 0, kind: input, shape index: {}]   ;;  %s1909_s1 = inlined_call_operand.vmem [shape: bf16[16,256], index: 1, kind: input, shape index: {}]   ;;  %s1910_s2 = inlined_call_operand.vmem [shape: f32[1,256], index: 2, kind: input, shape index: {}]   ;;  %s1911_s3 = inlined_call_operand.vmem [shape: bf16[128,2], index: 3, kind: input, shape index: {}]   ;;  %s1912_s4 = inlined_call_operand.hbm [shape: bf16[2,128,128], index: 4, kind: output, shape index: {0}]   ;;  %s1913_s5 = inlined_call_operand.hbm [shape: bf16[2,128,128], index: 5, kind: output, shape index: {1}]   ;;  %s1914_s6 = inlined_call_operand.vmem [shape: f32[2,128,2], index: 6, kind: output, shape index: {2}]  }
   0x1   :  { %1916 = sst [smem:[#allocation8_spill]] %s1908_s0 }
   0x2   :  { %1917 = sst [smem:[#allocation9_spill]] %s1909_s1 }
   0x3   :  { %12 = vsyncpa [#allocation3], 0 }
   0x4   :  { %14 = vsyncpa [#allocation3 + $0x1], 0 }
   0x5   :  { %15 = vsyncpa [#allocation5], 0 }
   0x6   :  { %17 = vsyncpa [#allocation5 + $0x1], 0  ;;  %s1599_s21 = smov 0   ;;  %s1601_s22 = smov 0  }
   0x7   :  { %s1603_s23 = smov 0   ;;  %s1605_s24 = smov 0  }
   0x8   :  { %s1607_s25 = smov 0   ;;  %s1609_s26 = smov 0  }
   0x9 LB: > { %s1110_s27 = sadd.s32 4294967295, %s1557_s26   ;;  %s1111_s28 = sadd.s32 4294967294, %s1557_s26   ;;  %s1557_s26 = sphi %s1609_s26, %s23_s26   ;;  %s1553_s25 = sphi %s1607_s25, %s1927_s25   ;;  %s1549_s24 = sphi %s1605_s24, %s1926_s24   ;;  %s1545_s23 = sphi %s1603_s23, %s1925_s23   ;;  %s1541_s22 = sphi %s1601_s22, %s1924_s22   ;;  %s1537_s21 = sphi %s1599_s21, %s1923_s21  }
   0xa   : > { %s35_s29 = sadd.s32 1, %s1553_s25  ;;  %s135_s30 = sadd.s32 1, %s1545_s23 }
   0xb   : > { %p37_p0 = scmp.ge.s32.totalorder %s35_s29, 2  ;;  %p145_p1 = scmp.ne.s32.totalorder %s1545_s23, %s1541_s22 }
   0xc   : > { %p146_p2 = scmp.eq.s32.totalorder %s1110_s27, 1  ;;  %p151_p3 = scmp.ne.s32.totalorder %s1541_s22, %s1537_s21 }
   0xd   : > { %s1929_s29 = smov (%p37_p0, %s35_s29), 0  ;;  %p152_p5 = scmp.eq.s32.totalorder %s1111_s28, 1 }
   0xe   : > { %p1639_p4 = por %p146_p2, %p145_p1  ;;  %s130_s8 = ssub.s32 %s1553_s25, %s1929_s29 }
   0xf   : > { %p1114_p6 = scmp.ge.s32.totalorder %s1557_s26, 1  ;;  %p133_p7 = scmp.eq.s32.totalorder %s130_s8, 0 }
  0x10   : > { %p1646_p8 = por %p152_p5, %p151_p3  ;;  %p248_p9 = scmp.lt.s32.totalorder %s1557_s26, 3 }
  0x11   : > { %s1652_s10 = scalar_select %p133_p7, %s1545_s23, %s135_s30  }
  0x12   : > { %p249_p10 = pnand %p1114_p6, %p248_p9 }
  0x13   : > { %s1920_s1 = sld [smem:[#allocation9_spill]] (!%p249_p10)  ;;  %p297_p11 = scmp.lt.s32.totalorder (!%p249_p10), %s1549_s24, 1  ;;  %v1559_v2 = vmov (!%p249_p10), 0   ;;  %v1439_v3 = vld [vmem:[%s1911_s3] sm:$0xff] (!%p249_p10)   ;;  %v1440_v4 = vld [vmem:[%s1911_s3 + $0x8] sm:$0xff] (!%p249_p10)   ;;  %vm399_vm0 = vcmask (!%p249_p10), 130048   ;;  %v339_v19 = vlaneseq (!%p249_p10) }
  0x14   : > { %252 = sbr.rel (%p249_p10) target bundleno = 526 (0x20e), region = 36  ;;  %456 = vmatprep.mubr.bf16.mxu0 (!%p249_p10), %v1559_v2  ;;  %1333 = vmatprep.subr.bf16.mxu1 (!%p249_p10), %v1439_v3  ;;  %s1921_s0 = sld [smem:[#allocation8_spill]] (!%p249_p10)  ;;  %v1441_v5 = vld [vmem:[%s1911_s3 + $0x10] sm:$0xff] (!%p249_p10)   ;;  %v1442_v7 = vld [vmem:[%s1911_s3 + $0x18] sm:$0xff] (!%p249_p10)   ;;  %v1443_v15 = vld [vmem:[%s1911_s3 + $0x20] sm:$0xff] (!%p249_p10)  }
  0x15   : > { %1334 = vmatpush3.bf16.msra.mxu1 (!%p249_p10), %v1439_v3  ;;  %v1444_v16 = vld [vmem:[%s1911_s3 + $0x28] sm:$0xff] (!%p249_p10)   ;;  %v1445_v17 = vld [vmem:[%s1911_s3 + $0x30] sm:$0xff] (!%p249_p10)   ;;  %v1446_v18 = vld [vmem:[%s1911_s3 + $0x38] sm:$0xff] (!%p249_p10)   ;;  %v340_v20 = vshrl.u32 (!%p249_p10), %v339_v19, 7  ;;  %s1716_s11 = sand.u32 (!%p249_p10), 1, %s1541_s22   ;;  %s1915_s15 = sshll.u32 (!%p249_p10), %s1549_s24, 10 }
  0x16   : > { %1335 = vmatprep.subr.bf16.mxu1 (!%p249_p10), %v1440_v4  ;;  %v337_v22 = vld [vmem:[%s1910_s2] sm:$0x3] (!%p249_p10)  ;;  %s1115_s12 = sshll.u32 (!%p249_p10), %s1716_s11, 6  ;;  %s908_s27 = scalar_lea.sflag (!%p249_p10), [#allocation3], %s1716_s11 }
  0x17   : > { %v341_v21 = vsub.s32 (!%p249_p10), 0, %v340_v20  ;;  %v345_v23 = vsub.s32 (!%p249_p10), 1, %v340_v20  ;;  %s1725_s13 = scalar_lea.vmem (!%p249_p10), [#allocation4], %s1115_s12  ;;  %s1730_s14 = scalar_lea.vmem (!%p249_p10), [#allocation2], %s1115_s12 }
  0x18   : > { %s937_s16 = sshll.u32 (!%p249_p10), %s1730_s14, 4  ;;  %s1782_s16 = int_to_ptr.vmem [resolvable:$true] %s937_s16 }
  0x19   : > { %v1428_v0 = vld [vmem:[%s1920_s1 + $0x4] ss:$8 sps:$4 sm:$0xff] (!%p249_p10)   ;;  %v1430_v1 = vld [vmem:[%s1920_s1] ss:$8 sps:$4 sm:$0xff] (!%p249_p10)   ;;  %1336 = vmatpush3.bf16.msra.mxu1 (!%p249_p10), %v1440_v4  ;;  %v1713_v24 = vrot.slane (!%p249_p10), %v337_v22, %v341_v21  ;;  %v1718_v26 = vrot.slane (!%p249_p10), %v337_v22, %v345_v23  ;;  %s1447_s28 = scalar_lea.vmem (!%p249_p10), %s1782_s16, 1024 }
  0x1a   : > { %424 = vmatprep.subr.bf16.mxu0 (!%p249_p10), %v1428_v0  ;;  %1337 = vmatprep.subr.bf16.mxu1 (!%p249_p10), %v1441_v5  ;;  %p1448_p12 = scmp.ne.s32.totalorder (!%p249_p10), %s1782_s16, %s1447_s28 }
  0x1b   : > { %s1665_s17 = scalar_select %p297_p11, %s1549_s24, 1  ;;  %425 = vmatpush1.bf16.msra.mxu0 %v1430_v1 }
  0x1c   : > { %p1449_p13 = pnand %p1448_p12, %p1639_p4 }
  0x1d   : > { %s1187_s20 = sshll.u32 %s1665_s17, 6  ;;  %1338 = vmatpush3.bf16.msra.mxu1 %v1441_v5 }
  0x1e   : > { %s1674_s30 = scalar_lea.vmem %s1921_s0, %s1187_s20  ;;  %1339 = vmatprep.subr.bf16.mxu1 %v1442_v7  ;;  %s1780_s20 = scalar_lea.hbm %s1912_s4, %s1915_s15 }
  0x1f   : > { %v1431_v6 = vld [vmem:[%s1674_s30] sm:$0xff]   ;;  %v1432_v8 = vld [vmem:[%s1674_s30 + $0x8] sm:$0xff]   ;;  %v1433_v9 = vld [vmem:[%s1674_s30 + $0x10] sm:$0xff]   ;;  %p1450_p0 = pneg %p1449_p13 }
  0x20   : > { %1131 = vmatmul.mubr.msk.bf16.vlgmr.msra.gmra.mrb[0].mxu0 %vm399_vm0, %v1431_v6  ;;  %v1434_v10 = vld [vmem:[%s1674_s30 + $0x18] sm:$0xff]   ;;  %v1435_v11 = vld [vmem:[%s1674_s30 + $0x20] sm:$0xff]   ;;  %v1436_v12 = vld [vmem:[%s1674_s30 + $0x28] sm:$0xff]  }
  0x21   : > { %466 = vmatprep.mubr.bf16.mxu0 %v1559_v2  ;;  %1340 = vmatpush3.bf16.msra.mxu1 %v1442_v7  ;;  %v1437_v13 = vld [vmem:[%s1674_s30 + $0x30] sm:$0xff]   ;;  %v1438_v14 = vld [vmem:[%s1674_s30 + $0x38] sm:$0xff]   ;;  %s1560_s30 = smov [#allocation2]  }
  0x22   : > { %1341 = vmatprep.subr.bf16.mxu1 %v1443_v15  ;;  %s1451_s8 = sshll.u32 %s1560_s30, 4  ;;  %s1452_s8 = int_to_ptr.vmem [resolvable:$false] %s1451_s8 }
  0x23   : > { %s1453_s12 = scalar_lea.vmem %s1452_s8, 2048  ;;  %p1454_p1 = scmp.lt.s32.totalorder %s1782_s16, %s1452_s8 }
  0x24   : > { %p1455_p2 = scmp.lt.s32.totalorder %s1453_s12, %s1447_s28 }
  0x25   : > { %1342 = vmatpush3.bf16.msra.mxu1 %v1443_v15 }
  0x26   : > { %1343 = vmatprep.subr.bf16.mxu1 %v1444_v16  ;;  %p1456_p3 = por %p1455_p2, %p1454_p1 }
  0x28   : > { %1132 = vmatmul.mubr.msk.bf16.gmra.mrb[4].mxu0 %vm399_vm0, %v1432_v8  ;;  %p1457_p5 = pnand %p1456_p3, %p1450_p0 }
  0x29   : > { %476 = vmatprep.mubr.bf16.mxu0 %v1559_v2  ;;  %1344 = vmatpush3.bf16.msra.mxu1 %v1444_v16 }
  0x2a   : > { %1345 = vmatprep.subr.bf16.mxu1 %v1445_v17 }
  0x2d   : > { %1346 = vmatpush3.bf16.msra.mxu1 %v1445_v17 }
  0x2e   : > { %1347 = vmatprep.subr.bf16.mxu1 %v1446_v18 }
  0x30   : > { %1133 = vmatmul.mubr.msk.bf16.gmra.mrb[8].mxu0 %vm399_vm0, %v1433_v9 }
  0x31   : > { %486 = vmatprep.mubr.bf16.mxu0 %v1559_v2  ;;  %1348 = vmatpush3.bf16.msra.mxu1 %v1446_v18 }
  0x38   : > { %1134 = vmatmul.mubr.msk.bf16.gmra.mrb[12].mxu0 %vm399_vm0, %v1434_v10 }
  0x39   : > { %496 = vmatprep.mubr.bf16.mxu0 %v1559_v2 }
  0x40   : > { %1135 = vmatmul.mubr.msk.bf16.gmra.mrb[16].mxu0 %vm399_vm0, %v1435_v11 }
  0x41   : > { %506 = vmatprep.mubr.bf16.mxu0 %v1559_v2 }
  0x48   : > { %1136 = vmatmul.mubr.msk.bf16.gmra.mrb[20].mxu0 %vm399_vm0, %v1436_v12 }
  0x49   : > { %516 = vmatprep.mubr.bf16.mxu0 %v1559_v2 }
  0x50   : > { %1137 = vmatmul.mubr.msk.bf16.gmra.mrb[24].mxu0 %vm399_vm0, %v1437_v13 }
  0x51   : > { %526 = vmatprep.mubr.bf16.mxu0 %v1559_v2 }
  0x58   : > { %1138 = vmatmul.mubr.msk.bf16.gmra.mrb[28].mxu0 %vm399_vm0, %v1438_v14 }
  0xf3   : > { %v458_v25 = vpop.f32.mrb[0].mxu0 }
  0xf4   : > { %v459_v27 = vadd.f32 %v458_v25, %v1713_v24  ;;  %v460_v28 = vpop.f32.mrb[1].mxu0 }
  0xf5   : > { %v462_v29 = vpop.f32.mrb[2].mxu0  ;;  %v461_v33 = vadd.f32 %v460_v28, %v1718_v26 }
  0xf6   : > { %v537_v30 = vmul.f32 0.2, %v459_v27  ;;  %v463_v31 = vadd.f32 %v462_v29, %v1713_v24  ;;  %v464_v32 = vpop.f32.mrb[3].mxu0 }
  0xf7   : > { %v465_v34 = vadd.f32 %v464_v32, %v1718_v26 }
  0xf8   : > { %v538_v35 = vmul.f32 0.2, %v463_v31  ;;  %v553_v37 = vmax.f32 %v459_v27, %v537_v30 }
  0xf9   : > { %v1266_v36 = vpack.c.bf16 %v465_v34, %v461_v33 }
  0xfa   : > { %v554_v38 = vmax.f32 %v463_v31, %v538_v35 }
  0xfb   : > { %1267 = vst [vmem:[%s1725_s13] sm:$0xff] %v1266_v36   ;;  %v468_v39 = vpop.f32.mrb[4].mxu0 }
  0xfc   : > { %v469_v40 = vadd.f32 %v468_v39, %v1713_v24  ;;  %v470_v41 = vpop.f32.mrb[5].mxu0  ;;  %v569_v42 = vpack.c.bf16 %v554_v38, %v553_v37 }
  0xfd   : > { %v472_v43 = vpop.f32.mrb[6].mxu0  ;;  %v471_v47 = vadd.f32 %v470_v41, %v1718_v26 }
  0xfe   : > { %v539_v44 = vmul.f32 0.2, %v469_v40  ;;  %v473_v45 = vadd.f32 %v472_v43, %v1713_v24  ;;  %v474_v46 = vpop.f32.mrb[7].mxu0  ;;  %1227 = vst [vmem:[%s1730_s14] sm:$0xff] %v569_v42   ;;  %1349 = vmatprep.mubr.bf16.mxu1 %v569_v42 }
  0xff   : > { %v475_v48 = vadd.f32 %v474_v46, %v1718_v26 }
 0x100   : > { %v540_v49 = vmul.f32 0.2, %v473_v45  ;;  %v555_v51 = vmax.f32 %v469_v40, %v539_v44 }
 0x101   : > { %v1271_v50 = vpack.c.bf16 %v475_v48, %v471_v47 }
 0x102   : > { %v556_v52 = vmax.f32 %v473_v45, %v540_v49 }
 0x103   : > { %1310 = vst [vmem:[%s1725_s13 + $0x8] sm:$0xff] %v1271_v50   ;;  %v478_v53 = vpop.f32.mrb[8].mxu0 }
 0x104   : > { %v479_v54 = vadd.f32 %v478_v53, %v1713_v24  ;;  %v480_v55 = vpop.f32.mrb[9].mxu0  ;;  %v570_v56 = vpack.c.bf16 %v556_v52, %v555_v51 }
 0x105   : > { %v482_v57 = vpop.f32.mrb[10].mxu0  ;;  %v481_v61 = vadd.f32 %v480_v55, %v1718_v26 }
 0x106   : > { %v541_v58 = vmul.f32 0.2, %v479_v54  ;;  %v483_v59 = vadd.f32 %v482_v57, %v1713_v24  ;;  %v484_v60 = vpop.f32.mrb[11].mxu0  ;;  %1303 = vst [vmem:[%s1730_s14 + $0x8] sm:$0xff] %v570_v56   ;;  %1350 = vmatmul.mubr.bf16.vlgmr.msra.gmra.mrb[0].mxu1 %v570_v56 }
 0x107   : > { %v485_v62 = vadd.f32 %v484_v60, %v1718_v26 }
 0x108   : > { %v542_v63 = vmul.f32 0.2, %v483_v59  ;;  %v557_v1 = vmax.f32 %v479_v54, %v541_v58 }
 0x109   : > { %v1276_v0 = vpack.c.bf16 %v485_v62, %v481_v61 }
 0x10a   : > { %v558_v2 = vmax.f32 %v483_v59, %v542_v63 }
 0x10b   : > { %1311 = vst [vmem:[%s1725_s13 + $0x10] sm:$0xff] %v1276_v0   ;;  %v488_v3 = vpop.f32.mrb[12].mxu0 }
 0x10c   : > { %v489_v4 = vadd.f32 %v488_v3, %v1713_v24  ;;  %v490_v5 = vpop.f32.mrb[13].mxu0  ;;  %v571_v6 = vpack.c.bf16 %v558_v2, %v557_v1 }
 0x10d   : > { %v492_v7 = vpop.f32.mrb[14].mxu0  ;;  %v491_v11 = vadd.f32 %v490_v5, %v1718_v26 }
 0x10e   : > { %v543_v8 = vmul.f32 0.2, %v489_v4  ;;  %v493_v9 = vadd.f32 %v492_v7, %v1713_v24  ;;  %v494_v10 = vpop.f32.mrb[15].mxu0  ;;  %1304 = vst [vmem:[%s1730_s14 + $0x10] sm:$0xff] %v571_v6   ;;  %1353 = vmatprep.mubr.bf16.mxu1 %v571_v6 }
 0x10f   : > { %v495_v12 = vadd.f32 %v494_v10, %v1718_v26 }
 0x110   : > { %v544_v13 = vmul.f32 0.2, %v493_v9  ;;  %v559_v15 = vmax.f32 %v489_v4, %v543_v8 }
 0x111   : > { %v1281_v14 = vpack.c.bf16 %v495_v12, %v491_v11 }
 0x112   : > { %v560_v16 = vmax.f32 %v493_v9, %v544_v13 }
 0x113   : > { %1312 = vst [vmem:[%s1725_s13 + $0x18] sm:$0xff] %v1281_v14   ;;  %v498_v17 = vpop.f32.mrb[16].mxu0 }
 0x114   : > { %v499_v18 = vadd.f32 %v498_v17, %v1713_v24  ;;  %v500_v19 = vpop.f32.mrb[17].mxu0  ;;  %v572_v20 = vpack.c.bf16 %v560_v16, %v559_v15 }
 0x115   : > { %v502_v21 = vpop.f32.mrb[18].mxu0  ;;  %v501_v27 = vadd.f32 %v500_v19, %v1718_v26 }
 0x116   : > { %v545_v22 = vmul.f32 0.2, %v499_v18  ;;  %v503_v23 = vadd.f32 %v502_v21, %v1713_v24  ;;  %v504_v25 = vpop.f32.mrb[19].mxu0  ;;  %1305 = vst [vmem:[%s1730_s14 + $0x18] sm:$0xff] %v572_v20   ;;  %1354 = vmatmul.mubr.bf16.gmra.mrb[4].mxu1 %v572_v20 }
 0x117   : > { %v505_v28 = vadd.f32 %v504_v25, %v1718_v26 }
 0x118   : > { %v546_v29 = vmul.f32 0.2, %v503_v23  ;;  %v561_v31 = vmax.f32 %v499_v18, %v545_v22 }
 0x119   : > { %v1286_v30 = vpack.c.bf16 %v505_v28, %v501_v27 }
 0x11a   : > { %v562_v32 = vmax.f32 %v503_v23, %v546_v29 }
 0x11b   : > { %1313 = vst [vmem:[%s1725_s13 + $0x20] sm:$0xff] %v1286_v30   ;;  %v508_v33 = vpop.f32.mrb[20].mxu0 }
 0x11c   : > { %v509_v34 = vadd.f32 %v508_v33, %v1713_v24  ;;  %v510_v35 = vpop.f32.mrb[21].mxu0  ;;  %v573_v36 = vpack.c.bf16 %v562_v32, %v561_v31 }
 0x11d   : > { %v512_v37 = vpop.f32.mrb[22].mxu0  ;;  %v511_v41 = vadd.f32 %v510_v35, %v1718_v26 }
 0x11e   : > { %v547_v38 = vmul.f32 0.2, %v509_v34  ;;  %v513_v39 = vadd.f32 %v512_v37, %v1713_v24  ;;  %v514_v40 = vpop.f32.mrb[23].mxu0  ;;  %1306 = vst [vmem:[%s1730_s14 + $0x20] sm:$0xff] %v573_v36   ;;  %1357 = vmatprep.mubr.bf16.mxu1 %v573_v36 }
 0x11f   : > { %v515_v42 = vadd.f32 %v514_v40, %v1718_v26 }
 0x120   : > { %v548_v43 = vmul.f32 0.2, %v513_v39  ;;  %v563_v45 = vmax.f32 %v509_v34, %v547_v38 }
 0x121   : > { %v1291_v44 = vpack.c.bf16 %v515_v42, %v511_v41 }
 0x122   : > { %v564_v46 = vmax.f32 %v513_v39, %v548_v43 }
 0x123   : > { %1314 = vst [vmem:[%s1725_s13 + $0x28] sm:$0xff] %v1291_v44   ;;  %v518_v47 = vpop.f32.mrb[24].mxu0 }
 0x124   : > { %v519_v48 = vadd.f32 %v518_v47, %v1713_v24  ;;  %v520_v49 = vpop.f32.mrb[25].mxu0  ;;  %v574_v50 = vpack.c.bf16 %v564_v46, %v563_v45 }
 0x125   : > { %v522_v51 = vpop.f32.mrb[26].mxu0  ;;  %v521_v55 = vadd.f32 %v520_v49, %v1718_v26 }
 0x126   : > { %v549_v52 = vmul.f32 0.2, %v519_v48  ;;  %v523_v53 = vadd.f32 %v522_v51, %v1713_v24  ;;  %v524_v54 = vpop.f32.mrb[27].mxu0  ;;  %1307 = vst [vmem:[%s1730_s14 + $0x28] sm:$0xff] %v574_v50   ;;  %1358 = vmatmul.mubr.bf16.gmra.mrb[8].mxu1 %v574_v50 }
 0x127   : > { %v525_v56 = vadd.f32 %v524_v54, %v1718_v26 }
 0x128   : > { %v550_v57 = vmul.f32 0.2, %v523_v53  ;;  %v565_v59 = vmax.f32 %v519_v48, %v549_v52 }
 0x129   : > { %v1296_v58 = vpack.c.bf16 %v525_v56, %v521_v55 }
 0x12a   : > { %v566_v60 = vmax.f32 %v523_v53, %v550_v57 }
 0x12b   : > { %1315 = vst [vmem:[%s1725_s13 + $0x30] sm:$0xff] %v1296_v58   ;;  %v528_v61 = vpop.f32.mrb[28].mxu0 }
 0x12c   : > { %v529_v62 = vadd.f32 %v528_v61, %v1713_v24  ;;  %v530_v63 = vpop.f32.mrb[29].mxu0  ;;  %v575_v0 = vpack.c.bf16 %v566_v60, %v565_v59 }
 0x12d   : > { %v532_v1 = vpop.f32.mrb[30].mxu0  ;;  %v531_v5 = vadd.f32 %v530_v63, %v1718_v26 }
 0x12e   : > { %v551_v2 = vmul.f32 0.2, %v529_v62  ;;  %v533_v3 = vadd.f32 %v532_v1, %v1713_v24  ;;  %v534_v4 = vpop.f32.mrb[31].mxu0  ;;  %1308 = vst [vmem:[%s1730_s14 + $0x30] sm:$0xff] %v575_v0   ;;  %1361 = vmatprep.mubr.bf16.mxu1 %v575_v0 }
 0x12f   : > { %v535_v6 = vadd.f32 %v534_v4, %v1718_v26 }
 0x130   : > { %v552_v7 = vmul.f32 0.2, %v533_v3  ;;  %v567_v9 = vmax.f32 %v529_v62, %v551_v2 }
 0x131   : > { %v1301_v8 = vpack.c.bf16 %v535_v6, %v531_v5 }
 0x132   : > { %v568_v10 = vmax.f32 %v533_v3, %v552_v7 }
 0x133   : > { %1316 = vst [vmem:[%s1725_s13 + $0x38] sm:$0xff] %v1301_v8  }
 0x134   : > { %v576_v11 = vpack.c.bf16 %v568_v10, %v567_v9 }
 0x136   : > { %1309 = vst [vmem:[%s1730_s14 + $0x38] sm:$0xff] %v576_v11   ;;  %1362 = vmatmul.mubr.bf16.gmra.mrb[12].mxu1 %v576_v11 }
 0x137   : > { %1460 = shalt.err (!%p1457_p5)
}
 0x138   : > { %s1461_s14 = scalar_lea.hbm %s1780_s20, 1024  ;;  %s1465_s30 = scalar_lea.hbm %s1912_s4, 2048 }
 0x139   : > { %p1462_p6 = scmp.ne.s32.totalorder %s1780_s20, %s1461_s14  ;;  %p1466_p10 = scmp.lt.u32.totalorder %s1780_s20, %s1912_s4 }
 0x13a   : > { %p1467_p11 = scmp.lt.u32.totalorder %s1465_s30, %s1461_s14  ;;  %p1469_p13 = scmp.lt.u32.totalorder %s1461_s14, %s1780_s20 }
 0x13b   : > { %p1463_p7 = pnand %p1462_p6, %p1639_p4 }
 0x13c   : > { %p1468_p12 = por %p1467_p11, %p1466_p10 }
 0x13d   : > { %p1464_p9 = pneg %p1463_p7 }
 0x13e   : > { %p1470_p0 = por %p1469_p13, %p1468_p12 }
 0x140   : > { %p1471_p1 = pnand %p1470_p0, %p1464_p9 }
 0x142   : > { %1474 = shalt.err (!%p1471_p1)
}
 0x143   : > { %s1561_s28 = smov 64   ;;  %s1562_s12 = smov 4  }
 0x144   : > { %1365 = dma.vmem_to_hbm [thread:$0]  (%p1639_p4), %s1782_s16, 1024, %s1780_s20, %s908_s27, %s1561_s28, %s1561_s28, %s1562_s12  }
 0x145   : > { %s1922_s15 = sshll.u32 %s1549_s24, 10  ;;  %s955_s30 = sshll.u32 %s1725_s13, 4  ;;  %s1819_s30 = int_to_ptr.vmem [resolvable:$true] %s955_s30 }
 0x146   : > { %s1816_s19 = scalar_lea.hbm %s1913_s5, %s1922_s15  ;;  %s913_s8 = scalar_lea.sflag [#allocation5], %s1716_s11 }
 0x147   : > { %s1475_s0 = scalar_lea.vmem %s1819_s30, 1024  ;;  %s1563_s1 = smov [#allocation4]  }
 0x148   : > { %p1476_p2 = scmp.ne.s32.totalorder %s1819_s30, %s1475_s0  ;;  %s1479_s16 = sshll.u32 %s1563_s1, 4  ;;  %s1480_s16 = int_to_ptr.vmem [resolvable:$false] %s1479_s16 }
 0x149   : > { %s1481_s24 = scalar_lea.vmem %s1480_s16, 2048  ;;  %p1482_p6 = scmp.lt.s32.totalorder %s1819_s30, %s1480_s16 }
 0x14a   : > { %p1477_p3 = pnand %p1476_p2, %p1639_p4  ;;  %p1483_p7 = scmp.lt.s32.totalorder %s1481_s24, %s1475_s0 }
 0x14c   : > { %p1478_p5 = pneg %p1477_p3  ;;  %p1484_p9 = por %p1483_p7, %p1482_p6 }
 0x14e   : > { %p1485_p10 = pnand %p1484_p9, %p1478_p5 }
 0x150   : > { %1488 = shalt.err (!%p1485_p10)
}
 0x151   : > { %s1489_s13 = scalar_lea.hbm %s1816_s19, 1024  ;;  %s1493_s1 = scalar_lea.hbm %s1913_s5, 2048 }
 0x152   : > { %p1490_p11 = scmp.ne.s32.totalorder %s1816_s19, %s1489_s13  ;;  %p1494_p0 = scmp.lt.u32.totalorder %s1816_s19, %s1913_s5 }
 0x153   : > { %p1495_p1 = scmp.lt.u32.totalorder %s1493_s1, %s1489_s13  ;;  %p1497_p3 = scmp.lt.u32.totalorder %s1489_s13, %s1816_s19 }
 0x154   : > { %p1491_p12 = pnand %p1490_p11, %p1639_p4 }
 0x155   : > { %p1496_p2 = por %p1495_p1, %p1494_p0 }
 0x156   : > { %p1492_p13 = pneg %p1491_p12 }
 0x157   : > { %p1498_p5 = por %p1497_p3, %p1496_p2 }
 0x159   : > { %p1499_p6 = pnand %p1498_p5, %p1492_p13 }
 0x15b   : > { %1502 = shalt.err (!%p1499_p6)
}
 0x15c   : > { %1366 = dma.vmem_to_hbm [thread:$0]  (%p1639_p4), %s1819_s30, 1024, %s1816_s19, %s913_s8, %s1561_s28, %s1561_s28, %s1562_s12   ;;  %vm890_vm1 = vcmask 15360  }
 0x15d   : > { %s1188_s0 = sshll.u32 %s1665_s17, 7 }
 0x15e   : > { %s1852_s24 = scalar_lea.vmem %s1914_s6, %s1188_s0 }
 0x1d9   : > { %v1351_v24 = vpop.f32.mrb[0].mxu1 }
 0x1da   : > { %893 = vst.msk [vmem:[%s1852_s24 + $0x10] sm:$0xff] %vm890_vm1, %v1351_v24  ;;  %v827_v26 = vpop.f32.mrb[1].mxu1 }
 0x1db   : > { %891 = vst.msk [vmem:[%s1852_s24] sm:$0xff] %vm890_vm1, %v827_v26  ;;  %v1352_v12 = vpop.f32.mrb[2].mxu1 }
 0x1dc   : > { %894 = vst.msk [vmem:[%s1852_s24 + $0x18] sm:$0xff] %vm890_vm1, %v1352_v12  ;;  %v830_v13 = vpop.f32.mrb[3].mxu1 }
 0x1dd   : > { %892 = vst.msk [vmem:[%s1852_s24 + $0x8] sm:$0xff] %vm890_vm1, %v830_v13 }
 0x1e9   : > { %v1355_v14 = vpop.f32.mrb[4].mxu1 }
 0x1ea   : > { %897 = vst.msk [vmem:[%s1852_s24 + $0x30] sm:$0xff] %vm890_vm1, %v1355_v14  ;;  %v843_v15 = vpop.f32.mrb[5].mxu1 }
 0x1eb   : > { %895 = vst.msk [vmem:[%s1852_s24 + $0x20] sm:$0xff] %vm890_vm1, %v843_v15  ;;  %v1356_v16 = vpop.f32.mrb[6].mxu1 }
 0x1ec   : > { %898 = vst.msk [vmem:[%s1852_s24 + $0x38] sm:$0xff] %vm890_vm1, %v1356_v16  ;;  %v846_v17 = vpop.f32.mrb[7].mxu1 }
 0x1ed   : > { %896 = vst.msk [vmem:[%s1852_s24 + $0x28] sm:$0xff] %vm890_vm1, %v846_v17 }
 0x1f9   : > { %v1359_v18 = vpop.f32.mrb[8].mxu1 }
 0x1fa   : > { %901 = vst.msk [vmem:[%s1852_s24 + $0x50] sm:$0xff] %vm890_vm1, %v1359_v18  ;;  %v859_v19 = vpop.f32.mrb[9].mxu1 }
 0x1fb   : > { %899 = vst.msk [vmem:[%s1852_s24 + $0x40] sm:$0xff] %vm890_vm1, %v859_v19  ;;  %v1360_v20 = vpop.f32.mrb[10].mxu1 }
 0x1fc   : > { %902 = vst.msk [vmem:[%s1852_s24 + $0x58] sm:$0xff] %vm890_vm1, %v1360_v20  ;;  %v862_v21 = vpop.f32.mrb[11].mxu1 }
 0x1fd   : > { %900 = vst.msk [vmem:[%s1852_s24 + $0x48] sm:$0xff] %vm890_vm1, %v862_v21 }
 0x209   : > { %v1363_v22 = vpop.f32.mrb[12].mxu1 }
 0x20a   : > { %905 = vst.msk [vmem:[%s1852_s24 + $0x70] sm:$0xff] %vm890_vm1, %v1363_v22  ;;  %v875_v23 = vpop.f32.mrb[13].mxu1 }
 0x20b   : > { %903 = vst.msk [vmem:[%s1852_s24 + $0x60] sm:$0xff] %vm890_vm1, %v875_v23  ;;  %v1364_v25 = vpop.f32.mrb[14].mxu1 }
 0x20c   : > { %906 = vst.msk [vmem:[%s1852_s24 + $0x78] sm:$0xff] %vm890_vm1, %v1364_v25  ;;  %v878_v27 = vpop.f32.mrb[15].mxu1 }
 0x20d   : > { %904 = vst.msk [vmem:[%s1852_s24 + $0x68] sm:$0xff] %vm890_vm1, %v878_v27 }
 0x20e PF: > { %p1376_p4 = scmp.ge.s32.totalorder %s1557_s26, 2  ;;  %s974_s7 = sand.u32 1, %s1537_s21  }
 0x20f   : > { %s975_s17 = scalar_lea.sflag [#allocation3], %s974_s7 }
 0x210   : > { %p1370_p7 = pnand %p1376_p4, %p1646_p8 }
 0x212   : > { %1528 = dma.done.wait (!%p1370_p7), %s975_s17, 1024  }
 0x213   : > { %1530 = vsyncadd (!%p1370_p7), %s975_s17, 4294966272  ;;  %s984_s11 = scalar_lea.sflag [#allocation5], %s974_s7 }
 0x214   : > { %1532 = dma.done.wait (!%p1370_p7), %s984_s11, 1024  }
 0x215   : > { %1534 = vsyncadd (!%p1370_p7), %s984_s11, 4294966272  ;;  %s23_s26 = sadd.s32 1, %s1557_s26   ;;  %s1923_s21 = smov %s1541_s22 }
 0x216   : > { %p20_p9 = scmp.ge.s32.totalorder %s23_s26, 4   ;;  %s1924_s22 = smov %s1545_s23 }
 0x217   : > { %s1925_s23 = smov %s1652_s10  ;;  %s1926_s24 = smov %s1553_s25 }
 0x218   : > { %s1927_s25 = smov %s1929_s29  ;;  %22 = sbr.rel (!%p20_p9) target bundleno = 9 (0x9), region = 100 }
 0x21f   :  { %1001 = vsyncpa [#allocation3], 1 }
 0x220   :  { %1003 = vsyncpa [#allocation3 + $0x1], 1 }
 0x221   :  { %1004 = vsyncpa [#allocation5], 1 }
 0x222   :  { %1006 = vsyncpa [#allocation5 + $0x1], 1 }

</bundles_post_ra>
